<compile_context>
chip_gen: v7x
topology: tpu7x:2x2x1
jax: 0.10.0
libtpu: 0.0.40
codegen_flags: <defaults>
</compile_context>

<pallas_src>
import jax
import jax.numpy as jnp
from jax import lax
from jax.experimental import pallas as pl
from jax.experimental.pallas import tpu as pltpu

HIDDEN_DIM = 32       # cmd_args.hidden_dim stand-in
VOCAB = 32            # len(dataset.attr_encoder.lookup_list) stand-in
N_NODES = 16
N_UNARY = 8           # unary clauses  -> (idx pair)   -> 3*H rep
N_BINARY = 8          # binary clauses -> (idx triple) -> 4*H rep


# ---------------------------------------------------------------------------
# Fused Pallas kernel
# ---------------------------------------------------------------------------
def fused_dq_policy_kernel(
        ids_ref, u0_ref, u1_ref, c0_ref, c1_ref, c2_ref,   # int32 (n, 1) index columns
        emb_ref, gw_ref, gb_ref,                           # embedding table + GNN projection
        w1u_ref, b1u_ref, w2u_ref, b2u_ref,                # binary_op_layer (unary clauses, 3H input)
        w1t_ref, b1t_ref, w2t_ref, b2t_ref,                # ternary_op_layer (binary clauses, 4H input)
        w3_ref, b3_ref, w4t_ref, b4_ref,                   # common_layer (w4 passed transposed: (1, H))
        out_ref):                                          # (n_unary + n_binary, 1) clause scores
    f32 = jnp.float32
    vocab, hidden = emb_ref.shape
    n_nodes = ids_ref.shape[0]

    def onehot_gather(col, table, n_rows):
        # Exact 0/1 selector matmul: row r of the result is table[col[r]].
        sel = (col == lax.broadcasted_iota(jnp.int32, (col.shape[0], n_rows), 1)).astype(f32)
        return jnp.dot(sel, table, preferred_element_type=f32)

    # --- GNN: embedding lookup + Linear/ReLU projection + mean pool ----------
    node_feats = onehot_gather(ids_ref[...], emb_ref[...], vocab)            # (n_nodes, H)
    local = jnp.dot(node_feats, gw_ref[...], preferred_element_type=f32) + gb_ref[...]
    local = jnp.maximum(local, 0.0)                                          # local_embedding
    g = jnp.sum(local, axis=0, keepdims=True) * (1.0 / n_nodes)              # global_embedding (1, H)

    # --- clause-rep row gathers from local_embedding -------------------------
    u0 = onehot_gather(u0_ref[...], local, n_nodes)                          # (n_unary, H)
    u1 = onehot_gather(u1_ref[...], local, n_nodes)
    b0 = onehot_gather(c0_ref[...], local, n_nodes)                          # (n_binary, H)
    b1 = onehot_gather(c1_ref[...], local, n_nodes)
    b2 = onehot_gather(c2_ref[...], local, n_nodes)

    # --- binary_op_layer on unary_rep = [u0 | u1 | g] (W1 applied block-wise,
    #     so the rep is never materialised; g contributes a rank-1 term) ------
    hu = (jnp.dot(u0, w1u_ref[0:hidden, :], preferred_element_type=f32)
          + jnp.dot(u1, w1u_ref[hidden:2 * hidden, :], preferred_element_type=f32)
          + jnp.dot(g, w1u_ref[2 * hidden:3 * hidden, :], preferred_element_type=f32)
          + b1u_ref[...])
    hu = jnp.maximum(hu, 0.0)
    hu = jnp.dot(hu, w2u_ref[...], preferred_element_type=f32) + b2u_ref[...]

    # --- ternary_op_layer on binary_rep = [b0 | b1 | b2 | g] ------------------
    hb = (jnp.dot(b0, w1t_ref[0:hidden, :], preferred_element_type=f32)
          + jnp.dot(b1, w1t_ref[hidden:2 * hidden, :], preferred_element_type=f32)
          + jnp.dot(b2, w1t_ref[2 * hidden:3 * hidden, :], preferred_element_type=f32)
          + jnp.dot(g, w1t_ref[3 * hidden:4 * hidden, :], preferred_element_type=f32)
          + b1t_ref[...])
    hb = jnp.maximum(hb, 0.0)
    hb = jnp.dot(hb, w2t_ref[...], preferred_element_type=f32) + b2t_ref[...]

    # --- shared common_layer, run ONCE on the stacked activations ------------
    h = jnp.concatenate([hu, hb], axis=0)                                    # (n_unary+n_binary, H)
    h = jnp.maximum(h, 0.0)
    h = jnp.maximum(jnp.dot(h, w3_ref[...], preferred_element_type=f32) + b3_ref[...], 0.0)
    # Final Linear(H, 1): VPU multiply by broadcast w4 row + lane reduce (no N=1 MXU matmul).
    out_ref[...] = jnp.sum(h * w4t_ref[...], axis=-1, keepdims=True) + b4_ref[...]


# ---------------------------------------------------------------------------
# Wrapper: one grid-less pallas_call, everything VMEM-resident
# ---------------------------------------------------------------------------
def dq_policy_forward(params, node_attr_ids, unary_idx, binary_idx):
    n_unary = unary_idx.shape[0]
    n_binary = binary_idx.shape[0]

    ids_col = node_attr_ids.reshape(-1, 1).astype(jnp.int32)
    u0 = unary_idx[:, 0:1].astype(jnp.int32)
    u1 = unary_idx[:, 1:2].astype(jnp.int32)
    c0 = binary_idx[:, 0:1].astype(jnp.int32)
    c1 = binary_idx[:, 1:2].astype(jnp.int32)
    c2 = binary_idx[:, 2:3].astype(jnp.int32)

    w3, b3, w4, b4 = params["common"]
    args = (ids_col, u0, u1, c0, c1, c2,
            params["embedding"], params["gnn_w"], params["gnn_b"],
            *params["binary_op"], *params["ternary_op"],
            w3, b3, w4.T, b4)

    vmem = pltpu.MemorySpace.VMEM
    out = pl.pallas_call(
        fused_dq_policy_kernel,
        out_shape=jax.ShapeDtypeStruct((n_unary + n_binary, 1), jnp.float32),
        in_specs=[pl.BlockSpec(memory_space=vmem)] * len(args),
        out_specs=pl.BlockSpec(memory_space=vmem),
    )(*args)

    # x = cat(unary_vals, binary_vals).view(1, -1)
    return out.reshape(1, n_unary + n_binary)


# ---------------------------------------------------------------------------
# Parameter construction (deterministic, synthetic)
# ---------------------------------------------------------------------------
def _linear(key, d_in, d_out):
    kw, kb = jax.random.split(key)
    scale = 1.0 / jnp.sqrt(d_in)
    w = jax.random.uniform(kw, (d_in, d_out), jnp.float32, -scale, scale)
    b = jax.random.uniform(kb, (1, d_out), jnp.float32, -scale, scale)
    return w, b


def init_params(key, hidden=HIDDEN_DIM, vocab=VOCAB):
    keys = jax.random.split(key, 8)
    params = {}
    # nn.Embedding(len(lookup_list), hidden_dim)
    params["embedding"] = jax.random.normal(keys[0], (vocab, hidden), jnp.float32)
    # stand-in GNN projection
    params["gnn_w"], params["gnn_b"] = _linear(keys[1], hidden, hidden)
    # binary_op_layer: Linear(3H, 2H), ReLU, Linear(2H, H)
    w, b = _linear(keys[2], 3 * hidden, 2 * hidden)
    w2, b2 = _linear(keys[3], 2 * hidden, hidden)
    params["binary_op"] = (w, b, w2, b2)
    # ternary_op_layer: Linear(4H, 2H), ReLU, Linear(2H, H)
    w, b = _linear(keys[4], 4 * hidden, 2 * hidden)
    w2, b2 = _linear(keys[5], 2 * hidden, hidden)
    params["ternary_op"] = (w, b, w2, b2)
    # common_layer: ReLU, Linear(H, H), ReLU, Linear(H, 1)
    w, b = _linear(keys[6], hidden, hidden)
    w2, b2 = _linear(keys[7], hidden, 1)
    params["common"] = (w, b, w2, b2)
    return params


# ---------------------------------------------------------------------------
# Pure-JAX reference for correctness checking.
# ---------------------------------------------------------------------------
def _ref_forward(params, node_attr_ids, unary_idx, binary_idx):
    hidden = params["embedding"].shape[1]
    node_feats = jnp.take(params["embedding"], node_attr_ids, axis=0)
    local = jnp.maximum(node_feats @ params["gnn_w"] + params["gnn_b"], 0.0)
    g = jnp.mean(local, axis=0)

    def mlp(rep, op, common):
        w1, b1, w2, b2 = op
        w3, b3, w4, b4 = common
        h = jnp.maximum(rep @ w1 + b1, 0.0) @ w2 + b2
        h = jnp.maximum(h, 0.0)
        h = jnp.maximum(h @ w3 + b3, 0.0)
        return h @ w4 + b4

    u_rep = jnp.concatenate(
        [local[unary_idx[:, 0]], local[unary_idx[:, 1]],
         jnp.broadcast_to(g, (unary_idx.shape[0], hidden))], axis=-1)
    b_rep = jnp.concatenate(
        [local[binary_idx[:, 0]], local[binary_idx[:, 1]], local[binary_idx[:, 2]],
         jnp.broadcast_to(g, (binary_idx.shape[0], hidden))], axis=-1)
    u = mlp(u_rep, params["binary_op"], params["common"]).reshape(-1)
    b = mlp(b_rep, params["ternary_op"], params["common"]).reshape(-1)
    return jnp.concatenate([u, b]).reshape(1, -1)


if __name__ == "__main__":
    key = jax.random.PRNGKey(0)
    k_param, k_attr, k_u, k_b = jax.random.split(key, 4)

    params = init_params(k_param)
    node_attr_ids = jax.random.randint(k_attr, (N_NODES,), 0, VOCAB)
    unary_idx = jax.random.randint(k_u, (N_UNARY, 2), 0, N_NODES)
    binary_idx = jax.random.randint(k_b, (N_BINARY, 3), 0, N_NODES)

    out = jax.jit(dq_policy_forward)(params, node_attr_ids, unary_idx, binary_idx)
    out = jax.block_until_ready(out)

    ref = _ref_forward(params, node_attr_ids, unary_idx, binary_idx)
    assert out.shape == (1, N_UNARY + N_BINARY), out.shape
    assert jnp.allclose(out, ref, atol=1e-4, rtol=1e-4), (out, ref)

    print("KERNEL_OK")
</pallas_src>

<mosaic_0001>
module attributes {stable_mosaic.version = 11 : i64} {
  func.func @fused_dq_policy_kernel(%arg0: memref<16x1xi32, #tpu.memory_space<vmem>>, %arg1: memref<8x1xi32, #tpu.memory_space<vmem>>, %arg2: memref<8x1xi32, #tpu.memory_space<vmem>>, %arg3: memref<8x1xi32, #tpu.memory_space<vmem>>, %arg4: memref<8x1xi32, #tpu.memory_space<vmem>>, %arg5: memref<8x1xi32, #tpu.memory_space<vmem>>, %arg6: memref<32x32xf32, #tpu.memory_space<vmem>>, %arg7: memref<32x32xf32, #tpu.memory_space<vmem>>, %arg8: memref<1x32xf32, #tpu.memory_space<vmem>>, %arg9: memref<96x64xf32, #tpu.memory_space<vmem>>, %arg10: memref<1x64xf32, #tpu.memory_space<vmem>>, %arg11: memref<64x32xf32, #tpu.memory_space<vmem>>, %arg12: memref<1x32xf32, #tpu.memory_space<vmem>>, %arg13: memref<128x64xf32, #tpu.memory_space<vmem>>, %arg14: memref<1x64xf32, #tpu.memory_space<vmem>>, %arg15: memref<64x32xf32, #tpu.memory_space<vmem>>, %arg16: memref<1x32xf32, #tpu.memory_space<vmem>>, %arg17: memref<32x32xf32, #tpu.memory_space<vmem>>, %arg18: memref<1x32xf32, #tpu.memory_space<vmem>>, %arg19: memref<1x32xf32, #tpu.memory_space<vmem>>, %arg20: memref<1x1xf32, #tpu.memory_space<vmem>>, %arg21: memref<16x1xf32, #tpu.memory_space<vmem>>) attributes {dimension_semantics = [], scalar_prefetch = 0 : i64, scratch_operands = 0 : i64, tpu.core_type = #tpu.core_type<tc>} {
    %c0 = arith.constant 0 : index
    %c0_0 = arith.constant 0 : index
    %0 = vector.load %arg0[%c0, %c0_0] : memref<16x1xi32, #tpu.memory_space<vmem>>, vector<16x1xi32>
    %c0_1 = arith.constant 0 : index
    %c0_2 = arith.constant 0 : index
    %1 = vector.load %arg6[%c0_1, %c0_2] : memref<32x32xf32, #tpu.memory_space<vmem>>, vector<32x32xf32>
    %2 = tpu.iota {dimensions = array<i32: 1>} : vector<16x32xi32>
    %3 = vector.broadcast %0 : vector<16x1xi32> to vector<16x32xi32>
    %4 = arith.cmpi eq, %3, %2 : vector<16x32xi32>
    %5 = arith.extui %4 : vector<16x32xi1> to vector<16x32xi32>
    %6 = arith.sitofp %5 : vector<16x32xi32> to vector<16x32xf32>
    %cst = arith.constant dense<0.000000e+00> : vector<16x32xf32>
    %7 = tpu.matmul %6, %1, %cst {dimension_numbers = #tpu.dot_dimension_numbers<[1], [0], [0], [1], [0, 0, 1, 1], [], []>} : vector<16x32xf32>, vector<32x32xf32>, vector<16x32xf32> -> vector<16x32xf32>
    %c0_3 = arith.constant 0 : index
    %c0_4 = arith.constant 0 : index
    %8 = vector.load %arg7[%c0_3, %c0_4] : memref<32x32xf32, #tpu.memory_space<vmem>>, vector<32x32xf32>
    %cst_5 = arith.constant dense<0.000000e+00> : vector<16x32xf32>
    %9 = tpu.matmul %7, %8, %cst_5 {dimension_numbers = #tpu.dot_dimension_numbers<[1], [0], [0], [1], [0, 0, 1, 1], [], []>} : vector<16x32xf32>, vector<32x32xf32>, vector<16x32xf32> -> vector<16x32xf32>
    %c0_6 = arith.constant 0 : index
    %c0_7 = arith.constant 0 : index
    %10 = vector.load %arg8[%c0_6, %c0_7] : memref<1x32xf32, #tpu.memory_space<vmem>>, vector<1x32xf32>
    %11 = vector.broadcast %10 : vector<1x32xf32> to vector<16x32xf32>
    %12 = arith.addf %9, %11 : vector<16x32xf32>
    %cst_8 = arith.constant 0.000000e+00 : f32
    %13 = vector.broadcast %cst_8 : f32 to vector<16x32xf32>
    %14 = arith.maximumf %12, %13 : vector<16x32xf32>
    %cst_9 = arith.constant dense<0.000000e+00> : vector<32xf32>
    %15 = vector.multi_reduction <add>, %14, %cst_9 [0] : vector<16x32xf32> to vector<32xf32>
    %16 = vector.shape_cast %15 : vector<32xf32> to vector<1x32xf32>
    %cst_10 = arith.constant 6.250000e-02 : f32
    %17 = vector.broadcast %cst_10 : f32 to vector<1x32xf32>
    %18 = arith.mulf %16, %17 : vector<1x32xf32>
    %c0_11 = arith.constant 0 : index
    %c0_12 = arith.constant 0 : index
    %19 = vector.load %arg1[%c0_11, %c0_12] : memref<8x1xi32, #tpu.memory_space<vmem>>, vector<8x1xi32>
    %20 = tpu.iota {dimensions = array<i32: 1>} : vector<8x16xi32>
    %21 = vector.broadcast %19 : vector<8x1xi32> to vector<8x16xi32>
    %22 = arith.cmpi eq, %21, %20 : vector<8x16xi32>
    %23 = arith.extui %22 : vector<8x16xi1> to vector<8x16xi32>
    %24 = arith.sitofp %23 : vector<8x16xi32> to vector<8x16xf32>
    %cst_13 = arith.constant dense<0.000000e+00> : vector<8x32xf32>
    %25 = tpu.matmul %24, %14, %cst_13 {dimension_numbers = #tpu.dot_dimension_numbers<[1], [0], [0], [1], [0, 0, 1, 1], [], []>} : vector<8x16xf32>, vector<16x32xf32>, vector<8x32xf32> -> vector<8x32xf32>
    %c0_14 = arith.constant 0 : index
    %c0_15 = arith.constant 0 : index
    %26 = vector.load %arg2[%c0_14, %c0_15] : memref<8x1xi32, #tpu.memory_space<vmem>>, vector<8x1xi32>
    %27 = tpu.iota {dimensions = array<i32: 1>} : vector<8x16xi32>
    %28 = vector.broadcast %26 : vector<8x1xi32> to vector<8x16xi32>
    %29 = arith.cmpi eq, %28, %27 : vector<8x16xi32>
    %30 = arith.extui %29 : vector<8x16xi1> to vector<8x16xi32>
    %31 = arith.sitofp %30 : vector<8x16xi32> to vector<8x16xf32>
    %cst_16 = arith.constant dense<0.000000e+00> : vector<8x32xf32>
    %32 = tpu.matmul %31, %14, %cst_16 {dimension_numbers = #tpu.dot_dimension_numbers<[1], [0], [0], [1], [0, 0, 1, 1], [], []>} : vector<8x16xf32>, vector<16x32xf32>, vector<8x32xf32> -> vector<8x32xf32>
    %c0_17 = arith.constant 0 : index
    %c0_18 = arith.constant 0 : index
    %33 = vector.load %arg3[%c0_17, %c0_18] : memref<8x1xi32, #tpu.memory_space<vmem>>, vector<8x1xi32>
    %34 = tpu.iota {dimensions = array<i32: 1>} : vector<8x16xi32>
    %35 = vector.broadcast %33 : vector<8x1xi32> to vector<8x16xi32>
    %36 = arith.cmpi eq, %35, %34 : vector<8x16xi32>
    %37 = arith.extui %36 : vector<8x16xi1> to vector<8x16xi32>
    %38 = arith.sitofp %37 : vector<8x16xi32> to vector<8x16xf32>
    %cst_19 = arith.constant dense<0.000000e+00> : vector<8x32xf32>
    %39 = tpu.matmul %38, %14, %cst_19 {dimension_numbers = #tpu.dot_dimension_numbers<[1], [0], [0], [1], [0, 0, 1, 1], [], []>} : vector<8x16xf32>, vector<16x32xf32>, vector<8x32xf32> -> vector<8x32xf32>
    %c0_20 = arith.constant 0 : index
    %c0_21 = arith.constant 0 : index
    %40 = vector.load %arg4[%c0_20, %c0_21] : memref<8x1xi32, #tpu.memory_space<vmem>>, vector<8x1xi32>
    %41 = tpu.iota {dimensions = array<i32: 1>} : vector<8x16xi32>
    %42 = vector.broadcast %40 : vector<8x1xi32> to vector<8x16xi32>
    %43 = arith.cmpi eq, %42, %41 : vector<8x16xi32>
    %44 = arith.extui %43 : vector<8x16xi1> to vector<8x16xi32>
    %45 = arith.sitofp %44 : vector<8x16xi32> to vector<8x16xf32>
    %cst_22 = arith.constant dense<0.000000e+00> : vector<8x32xf32>
    %46 = tpu.matmul %45, %14, %cst_22 {dimension_numbers = #tpu.dot_dimension_numbers<[1], [0], [0], [1], [0, 0, 1, 1], [], []>} : vector<8x16xf32>, vector<16x32xf32>, vector<8x32xf32> -> vector<8x32xf32>
    %c0_23 = arith.constant 0 : index
    %c0_24 = arith.constant 0 : index
    %47 = vector.load %arg5[%c0_23, %c0_24] : memref<8x1xi32, #tpu.memory_space<vmem>>, vector<8x1xi32>
    %48 = tpu.iota {dimensions = array<i32: 1>} : vector<8x16xi32>
    %49 = vector.broadcast %47 : vector<8x1xi32> to vector<8x16xi32>
    %50 = arith.cmpi eq, %49, %48 : vector<8x16xi32>
    %51 = arith.extui %50 : vector<8x16xi1> to vector<8x16xi32>
    %52 = arith.sitofp %51 : vector<8x16xi32> to vector<8x16xf32>
    %cst_25 = arith.constant dense<0.000000e+00> : vector<8x32xf32>
    %53 = tpu.matmul %52, %14, %cst_25 {dimension_numbers = #tpu.dot_dimension_numbers<[1], [0], [0], [1], [0, 0, 1, 1], [], []>} : vector<8x16xf32>, vector<16x32xf32>, vector<8x32xf32> -> vector<8x32xf32>
    %c0_26 = arith.constant 0 : index
    %c0_27 = arith.constant 0 : index
    %54 = vector.load %arg9[%c0_26, %c0_27] : memref<96x64xf32, #tpu.memory_space<vmem>>, vector<32x64xf32>
    %cst_28 = arith.constant dense<0.000000e+00> : vector<8x64xf32>
    %55 = tpu.matmul %25, %54, %cst_28 {dimension_numbers = #tpu.dot_dimension_numbers<[1], [0], [0], [1], [0, 0, 1, 1], [], []>} : vector<8x32xf32>, vector<32x64xf32>, vector<8x64xf32> -> vector<8x64xf32>
    %c32 = arith.constant 32 : index
    %c0_29 = arith.constant 0 : index
    %56 = vector.load %arg9[%c32, %c0_29] : memref<96x64xf32, #tpu.memory_space<vmem>>, vector<32x64xf32>
    %cst_30 = arith.constant dense<0.000000e+00> : vector<8x64xf32>
    %57 = tpu.matmul %32, %56, %cst_30 {dimension_numbers = #tpu.dot_dimension_numbers<[1], [0], [0], [1], [0, 0, 1, 1], [], []>} : vector<8x32xf32>, vector<32x64xf32>, vector<8x64xf32> -> vector<8x64xf32>
    %58 = arith.addf %55, %57 : vector<8x64xf32>
    %c64 = arith.constant 64 : index
    %c0_31 = arith.constant 0 : index
    %59 = vector.load %arg9[%c64, %c0_31] : memref<96x64xf32, #tpu.memory_space<vmem>>, vector<32x64xf32>
    %cst_32 = arith.constant dense<0.000000e+00> : vector<1x64xf32>
    %60 = tpu.matmul %18, %59, %cst_32 {dimension_numbers = #tpu.dot_dimension_numbers<[1], [0], [0], [1], [0, 0, 1, 1], [], []>} : vector<1x32xf32>, vector<32x64xf32>, vector<1x64xf32> -> vector<1x64xf32>
    %61 = vector.broadcast %60 : vector<1x64xf32> to vector<8x64xf32>
    %62 = arith.addf %58, %61 : vector<8x64xf32>
    %c0_33 = arith.constant 0 : index
    %c0_34 = arith.constant 0 : index
    %63 = vector.load %arg10[%c0_33, %c0_34] : memref<1x64xf32, #tpu.memory_space<vmem>>, vector<1x64xf32>
    %64 = vector.broadcast %63 : vector<1x64xf32> to vector<8x64xf32>
    %65 = arith.addf %62, %64 : vector<8x64xf32>
    %cst_35 = arith.constant 0.000000e+00 : f32
    %66 = vector.broadcast %cst_35 : f32 to vector<8x64xf32>
    %67 = arith.maximumf %65, %66 : vector<8x64xf32>
    %c0_36 = arith.constant 0 : index
    %c0_37 = arith.constant 0 : index
    %68 = vector.load %arg11[%c0_36, %c0_37] : memref<64x32xf32, #tpu.memory_space<vmem>>, vector<64x32xf32>
    %cst_38 = arith.constant dense<0.000000e+00> : vector<8x32xf32>
    %69 = tpu.matmul %67, %68, %cst_38 {dimension_numbers = #tpu.dot_dimension_numbers<[1], [0], [0], [1], [0, 0, 1, 1], [], []>} : vector<8x64xf32>, vector<64x32xf32>, vector<8x32xf32> -> vector<8x32xf32>
    %c0_39 = arith.constant 0 : index
    %c0_40 = arith.constant 0 : index
    %70 = vector.load %arg12[%c0_39, %c0_40] : memref<1x32xf32, #tpu.memory_space<vmem>>, vector<1x32xf32>
    %71 = vector.broadcast %70 : vector<1x32xf32> to vector<8x32xf32>
    %72 = arith.addf %69, %71 : vector<8x32xf32>
    %c0_41 = arith.constant 0 : index
    %c0_42 = arith.constant 0 : index
    %73 = vector.load %arg13[%c0_41, %c0_42] : memref<128x64xf32, #tpu.memory_space<vmem>>, vector<32x64xf32>
    %cst_43 = arith.constant dense<0.000000e+00> : vector<8x64xf32>
    %74 = tpu.matmul %39, %73, %cst_43 {dimension_numbers = #tpu.dot_dimension_numbers<[1], [0], [0], [1], [0, 0, 1, 1], [], []>} : vector<8x32xf32>, vector<32x64xf32>, vector<8x64xf32> -> vector<8x64xf32>
    %c32_44 = arith.constant 32 : index
    %c0_45 = arith.constant 0 : index
    %75 = vector.load %arg13[%c32_44, %c0_45] : memref<128x64xf32, #tpu.memory_space<vmem>>, vector<32x64xf32>
    %cst_46 = arith.constant dense<0.000000e+00> : vector<8x64xf32>
    %76 = tpu.matmul %46, %75, %cst_46 {dimension_numbers = #tpu.dot_dimension_numbers<[1], [0], [0], [1], [0, 0, 1, 1], [], []>} : vector<8x32xf32>, vector<32x64xf32>, vector<8x64xf32> -> vector<8x64xf32>
    %77 = arith.addf %74, %76 : vector<8x64xf32>
    %c64_47 = arith.constant 64 : index
    %c0_48 = arith.constant 0 : index
    %78 = vector.load %arg13[%c64_47, %c0_48] : memref<128x64xf32, #tpu.memory_space<vmem>>, vector<32x64xf32>
    %cst_49 = arith.constant dense<0.000000e+00> : vector<8x64xf32>
    %79 = tpu.matmul %53, %78, %cst_49 {dimension_numbers = #tpu.dot_dimension_numbers<[1], [0], [0], [1], [0, 0, 1, 1], [], []>} : vector<8x32xf32>, vector<32x64xf32>, vector<8x64xf32> -> vector<8x64xf32>
    %80 = arith.addf %77, %79 : vector<8x64xf32>
    %c96 = arith.constant 96 : index
    %c0_50 = arith.constant 0 : index
    %81 = vector.load %arg13[%c96, %c0_50] : memref<128x64xf32, #tpu.memory_space<vmem>>, vector<32x64xf32>
    %cst_51 = arith.constant dense<0.000000e+00> : vector<1x64xf32>
    %82 = tpu.matmul %18, %81, %cst_51 {dimension_numbers = #tpu.dot_dimension_numbers<[1], [0], [0], [1], [0, 0, 1, 1], [], []>} : vector<1x32xf32>, vector<32x64xf32>, vector<1x64xf32> -> vector<1x64xf32>
    %83 = vector.broadcast %82 : vector<1x64xf32> to vector<8x64xf32>
    %84 = arith.addf %80, %83 : vector<8x64xf32>
    %c0_52 = arith.constant 0 : index
    %c0_53 = arith.constant 0 : index
    %85 = vector.load %arg14[%c0_52, %c0_53] : memref<1x64xf32, #tpu.memory_space<vmem>>, vector<1x64xf32>
    %86 = vector.broadcast %85 : vector<1x64xf32> to vector<8x64xf32>
    %87 = arith.addf %84, %86 : vector<8x64xf32>
    %cst_54 = arith.constant 0.000000e+00 : f32
    %88 = vector.broadcast %cst_54 : f32 to vector<8x64xf32>
    %89 = arith.maximumf %87, %88 : vector<8x64xf32>
    %c0_55 = arith.constant 0 : index
    %c0_56 = arith.constant 0 : index
    %90 = vector.load %arg15[%c0_55, %c0_56] : memref<64x32xf32, #tpu.memory_space<vmem>>, vector<64x32xf32>
    %cst_57 = arith.constant dense<0.000000e+00> : vector<8x32xf32>
    %91 = tpu.matmul %89, %90, %cst_57 {dimension_numbers = #tpu.dot_dimension_numbers<[1], [0], [0], [1], [0, 0, 1, 1], [], []>} : vector<8x64xf32>, vector<64x32xf32>, vector<8x32xf32> -> vector<8x32xf32>
    %c0_58 = arith.constant 0 : index
    %c0_59 = arith.constant 0 : index
    %92 = vector.load %arg16[%c0_58, %c0_59] : memref<1x32xf32, #tpu.memory_space<vmem>>, vector<1x32xf32>
    %93 = vector.broadcast %92 : vector<1x32xf32> to vector<8x32xf32>
    %94 = arith.addf %91, %93 : vector<8x32xf32>
    %95 = tpu.concatenate %72, %94 in 0 : vector<8x32xf32>, vector<8x32xf32> -> vector<16x32xf32>
    %cst_60 = arith.constant 0.000000e+00 : f32
    %96 = vector.broadcast %cst_60 : f32 to vector<16x32xf32>
    %97 = arith.maximumf %95, %96 : vector<16x32xf32>
    %c0_61 = arith.constant 0 : index
    %c0_62 = arith.constant 0 : index
    %98 = vector.load %arg17[%c0_61, %c0_62] : memref<32x32xf32, #tpu.memory_space<vmem>>, vector<32x32xf32>
    %cst_63 = arith.constant dense<0.000000e+00> : vector<16x32xf32>
    %99 = tpu.matmul %97, %98, %cst_63 {dimension_numbers = #tpu.dot_dimension_numbers<[1], [0], [0], [1], [0, 0, 1, 1], [], []>} : vector<16x32xf32>, vector<32x32xf32>, vector<16x32xf32> -> vector<16x32xf32>
    %c0_64 = arith.constant 0 : index
    %c0_65 = arith.constant 0 : index
    %100 = vector.load %arg18[%c0_64, %c0_65] : memref<1x32xf32, #tpu.memory_space<vmem>>, vector<1x32xf32>
    %101 = vector.broadcast %100 : vector<1x32xf32> to vector<16x32xf32>
    %102 = arith.addf %99, %101 : vector<16x32xf32>
    %cst_66 = arith.constant 0.000000e+00 : f32
    %103 = vector.broadcast %cst_66 : f32 to vector<16x32xf32>
    %104 = arith.maximumf %102, %103 : vector<16x32xf32>
    %c0_67 = arith.constant 0 : index
    %c0_68 = arith.constant 0 : index
    %105 = vector.load %arg19[%c0_67, %c0_68] : memref<1x32xf32, #tpu.memory_space<vmem>>, vector<1x32xf32>
    %106 = vector.broadcast %105 : vector<1x32xf32> to vector<16x32xf32>
    %107 = arith.mulf %104, %106 : vector<16x32xf32>
    %cst_69 = arith.constant dense<0.000000e+00> : vector<16xf32>
    %108 = vector.multi_reduction <add>, %107, %cst_69 [1] : vector<16x32xf32> to vector<16xf32>
    %109 = vector.shape_cast %108 : vector<16xf32> to vector<16x1xf32>
    %c0_70 = arith.constant 0 : index
    %c0_71 = arith.constant 0 : index
    %110 = vector.load %arg20[%c0_70, %c0_71] : memref<1x1xf32, #tpu.memory_space<vmem>>, vector<1x1xf32>
    %111 = vector.broadcast %110 : vector<1x1xf32> to vector<16x1xf32>
    %112 = arith.addf %109, %111 : vector<16x1xf32>
    %c0_72 = arith.constant 0 : index
    %c0_73 = arith.constant 0 : index
    %113 = vector.load %arg21[%c0_72, %c0_73] : memref<16x1xf32, #tpu.memory_space<vmem>>, vector<16x1xf32>
    tpu.vector_store %arg21[%c0_72, %c0_73], %112 {strides = array<i32>} : memref<16x1xf32, #tpu.memory_space<vmem>>, vector<16x1xf32>,
    return
  }
}

</mosaic_0001>

<bundles_post_ra>
// kernel: dq_policy_forward.1
= control target key start
LH: loop header
LB: loop body
LE: loop exit
PB: predicated region body
PF: predicated region fallthrough
CT: control target
= control target key end

     0   :  { %v1961_v0 = vmov 0   ;;  %v76_v17 = vlaneseq  ;;  %vm90_vm0 = vcmask 261120   ;;  %v1962_v20 = vmov 0.0   ;;  %s2394_s0 = inlined_call_operand.vmem [shape: s32[16,1], index: 0, kind: input, shape index: {}]   ;;  %s2395_s6 = inlined_call_operand.vmem [shape: f32[32,32], index: 6, kind: input, shape index: {}]   ;;  %s2396_s4 = inlined_call_operand.vmem [shape: s32[8,1], index: 4, kind: input, shape index: {}]   ;;  %s2397_s5 = inlined_call_operand.vmem [shape: s32[8,1], index: 5, kind: input, shape index: {}]   ;;  %s2398_s7 = inlined_call_operand.vmem [shape: f32[32,32], index: 7, kind: input, shape index: {}]   ;;  %s2399_s2 = inlined_call_operand.vmem [shape: s32[8,1], index: 2, kind: input, shape index: {}]   ;;  %s2400_s1 = inlined_call_operand.vmem [shape: s32[8,1], index: 1, kind: input, shape index: {}]   ;;  %s2401_s3 = inlined_call_operand.vmem [shape: s32[8,1], index: 3, kind: input, shape index: {}]   ;;  %s2402_s8 = inlined_call_operand.vmem [shape: f32[1,32], index: 8, kind: input, shape index: {}]   ;;  %s2403_s9 = inlined_call_operand.vmem [shape: f32[96,64], index: 9, kind: input, shape index: {}]   ;;  %s2404_s13 = inlined_call_operand.vmem [shape: f32[128,64], index: 13, kind: input, shape index: {}]   ;;  %s2405_s11 = inlined_call_operand.vmem [shape: f32[64,32], index: 11, kind: input, shape index: {}]   ;;  %s2406_s10 = inlined_call_operand.vmem [shape: f32[1,64], index: 10, kind: input, shape index: {}]   ;;  %s2407_s15 = inlined_call_operand.vmem [shape: f32[64,32], index: 15, kind: input, shape index: {}]   ;;  %s2408_s17 = inlined_call_operand.vmem [shape: f32[32,32], index: 17, kind: input, shape index: {}]   ;;  %s2409_s12 = inlined_call_operand.vmem [shape: f32[1,32], index: 12, kind: input, shape index: {}]   ;;  %s2410_s14 = inlined_call_operand.vmem [shape: f32[1,64], index: 14, kind: input, shape index: {}]   ;;  %s2411_s16 = inlined_call_operand.vmem [shape: f32[1,32], index: 16, kind: input, shape index: {}]   ;;  %s2412_s20 = inlined_call_operand.<no memory space> [shape: f32[1,1], index: 20, kind: input, shape index: {}]   ;;  %s2413_s18 = inlined_call_operand.vmem [shape: f32[1,32], index: 18, kind: input, shape index: {}]   ;;  %s2414_s19 = inlined_call_operand.vmem [shape: f32[1,32], index: 19, kind: input, shape index: {}]   ;;  %s2415_s21 = inlined_call_operand.vmem [shape: f32[16,1], index: 21, kind: output, shape index: {}]  }
   0x1   :  { %2419 = sst [smem:[#allocation3_spill]] %s2394_s0  ;;  %1959 = vset.pattern.permute.xlu0 %v1961_v0  ;;  %1960 = vset.pattern.permute.xlu1 %v1961_v0  ;;  %v276_v25 = vld [vmem:[%s2400_s1] sm:$0xff]  ;;  %v1963_v29 = vmov 0.0|0.0   ;;  %vm1964_vm3 = vmmov 0   ;;  %vm283_vm6 = vcmask 130048   ;;  %v682_v48 = vld [vmem:[%s2403_s9 + $0x28] sm:$0xff] }
   0x2   :  { %2420 = sst [smem:[#allocation4_spill]] %s2395_s6  ;;  %s2425_s26 = sld [smem:[#allocation3_spill]]  ;;  %v2112_v18 = vand.u32 127, %v76_v17  ;;  %v437_v26 = vld [vmem:[%s2401_s3] sm:$0xff]  ;;  %v678_v52 = vld [vmem:[%s2403_s9 + $0x8] sm:$0xff]  ;;  %v683_v55 = vld [vmem:[%s2403_s9 + $0x30] sm:$0xff] }
   0x3   :  { %2421 = sst [smem:[#allocation5_spill]] %s2396_s4  ;;  %s2426_s28 = sld [smem:[#allocation4_spill]]  ;;  %v1550_v31 = vld [vmem:[%s2402_s8] ss:$0 sm:$0xff]  ;;  %v684_v56 = vld [vmem:[%s2403_s9 + $0x38] sm:$0xff]  ;;  %v679_v59 = vld [vmem:[%s2403_s9 + $0x10] sm:$0xff] }
   0x4   :  { %2422 = sst [smem:[#allocation6_spill]] %s2397_s5  ;;  %s2427_s25 = sld [smem:[#allocation5_spill]]  ;;  %v681_v47 = vld [vmem:[%s2403_s9 + $0x20] sm:$0xff]  ;;  %v1885_v58 = vpack.c.bf16 %v684_v56, %v683_v55  ;;  %v680_v60 = vld [vmem:[%s2403_s9 + $0x18] sm:$0xff]  ;;  %vm937_vm10 = vcmask 523264   ;;  %vm1539_vm11 = vcmask 7168  }
   0x5   :  { %2423 = sst [smem:[#allocation7_spill]] %s2398_s7  ;;  %s2428_s5 = sld [smem:[#allocation6_spill]]  ;;  %v1882_v50 = vpack.c.bf16 %v682_v48, %v681_v47  ;;  %v677_v51 = vld [vmem:[%s2403_s9] sm:$0xff]  ;;  %v1891_v62 = vpack.c.bf16 %v680_v60, %v679_v59  ;;  %v925_v47 = vld [vmem:[%s2405_s11 + $0x18] sm:$0xff]  ;;  %v909_v60 = vshrl.u32 %v76_v17, 7 }
   0x6   :  { %2424 = sst [smem:[#allocation8_spill]] %s2399_s2  ;;  %s2429_s7 = sld [smem:[#allocation7_spill]]  ;;  %v1888_v57 = vpack.c.bf16 %v678_v52, %v677_v51  ;;  %v928_v52 = vld [vmem:[%s2405_s11 + $0x30] sm:$0xff] }
   0x8   :  { %v70_v1 = vld [vmem:[%s2425_s26] sm:$0xff]  ;;  %v71_v4 = vld [vmem:[%s2425_s26 + $0x8] sm:$0xff] }
   0x9   :  { %79 = vperm.xlu0 %1959, %v70_v1   ;;  %v72_v2 = vld [vmem:[%s2426_s28] sm:$0xff]  ;;  %v73_v3 = vld [vmem:[%s2426_s28 + $0x8] sm:$0xff]  ;;  %v74_v6 = vld [vmem:[%s2426_s28 + $0x10] sm:$0xff] }
   0xa   :  { %v1850_v5 = vpack.c.bf16 %v73_v3, %v72_v2  ;;  %v75_v7 = vld [vmem:[%s2426_s28 + $0x18] sm:$0xff]  ;;  %v517_v9 = vld [vmem:[%s2427_s25] sm:$0xff]  ;;  %s2430_s25 = sld [smem:[#allocation8_spill]] }
   0xb   :  { %v1854_v8 = vpack.c.bf16 %v75_v7, %v74_v6  ;;  %v597_v10 = vld [vmem:[%s2428_s5] sm:$0xff]  ;;  %v833_v7 = vld [vmem:[%s2403_s9 + $0x50] sm:$0xff] }
   0xc   :  { %1851 = vmatprep.subr.bf16.mxu0 %v1850_v5  ;;  %v172_v11 = vld [vmem:[%s2429_s7] sm:$0xff]  ;;  %v173_v12 = vld [vmem:[%s2429_s7 + $0x8] sm:$0xff]  ;;  %v174_v13 = vld [vmem:[%s2429_s7 + $0x10] sm:$0xff] }
   0xd   :  { %82 = vperm.xlu0 %1959, %v71_v4   ;;  %1853 = vmatpush3.bf16.msra.mxu0 %v1850_v5  ;;  %v1858_v14 = vpack.c.bf16 %v173_v12, %v172_v11  ;;  %v175_v15 = vld [vmem:[%s2429_s7 + $0x18] sm:$0xff]  ;;  %v831_v3 = vld [vmem:[%s2403_s9 + $0x40] sm:$0xff]  ;;  %v832_v4 = vld [vmem:[%s2403_s9 + $0x48] sm:$0xff] }
   0xe   :  { %1855 = vmatprep.subr.bf16.mxu0 %v1854_v8  ;;  %v1862_v16 = vpack.c.bf16 %v175_v15, %v174_v13  ;;  %v1894_v5 = vpack.c.bf16 %v832_v4, %v831_v3  ;;  %v1015_v15 = vld [vmem:[%s2404_s13 + $0x20] sm:$0xff]  ;;  %v1166_v4 = vld [vmem:[%s2404_s13 + $0x48] sm:$0xff] }
   0xf   :  { %1859 = vmatprep.subr.bf16.mxu1 %v1858_v14  ;;  %v1165_v3 = vld [vmem:[%s2404_s13 + $0x40] sm:$0xff] }
  0x10   :  { %1861 = vmatpush3.bf16.msra.mxu1 %v1858_v14  ;;  %v357_v24 = vld [vmem:[%s2430_s25] sm:$0xff]  ;;  %v1924_v17 = vpack.c.bf16 %v1166_v4, %v1165_v3 }
  0x11   :  { %519 = vperm.xlu0 %1959, %v517_v9   ;;  %1857 = vmatpush3.bf16.msra.mxu0 %v1854_v8  ;;  %v834_v8 = vld [vmem:[%s2403_s9 + $0x58] sm:$0xff] }
  0x12   :  { %1863 = vmatprep.subr.bf16.mxu1 %v1862_v16  ;;  %359 = vperm.xlu1 %1960, %v357_v24   ;;  %v1897_v13 = vpack.c.bf16 %v834_v8, %v833_v7  ;;  %v1167_v7 = vld [vmem:[%s2404_s13 + $0x50] sm:$0xff]  ;;  %v1168_v8 = vld [vmem:[%s2404_s13 + $0x58] sm:$0xff] }
  0x13   :  { %1866 = vmatprep.subr.bf16.mxu0 %v1963_v29 }
  0x14   :  { %1865 = vmatpush3.bf16.msra.mxu1 %v1862_v16  ;;  %v1016_v16 = vld [vmem:[%s2404_s13 + $0x28] sm:$0xff] }
  0x15   :  { %599 = vperm.xlu0 %1959, %v597_v10   ;;  %1869 = vmatprep.subr.bf16.mxu1 %v1963_v29 }
  0x16   :  { %278 = vperm.xlu1 %1960, %v276_v25   ;;  %v1017_v25 = vld [vmem:[%s2404_s13 + $0x30] sm:$0xff] }
  0x1a   :  { %439 = vperm.xlu1 %1960, %v437_v26   ;;  %v1018_v26 = vld [vmem:[%s2404_s13 + $0x38] sm:$0xff] }
  0x88   :  { %v80_v19 = vpop.permute.xlu0 %79 }
  0x89   :  { %vm84_vm1 = vcmp.eq.s32.totalorder %v80_v19, %v2112_v18 }
  0x8a   :  { %v1546_v21 = vsel %vm84_vm1, 1.0, %v1962_v20 }
  0x8b   :  { %1675 = vmatprep.mubr.msk.f32.mxu0 %vm90_vm0, %v1546_v21 }
  0x8c   :  { %v83_v22 = vpop.permute.xlu0 %82 }
  0x8d   :  { %vm85_vm2 = vcmp.eq.s32.totalorder %v83_v22, %v2112_v18 }
  0x8e   :  { %v1547_v23 = vsel %vm85_vm2, 1.0, %v1962_v20 }
  0x8f   :  { %1676 = vmatmul.mubr.msk.f32.vlgmr.msra.gmra.mrb[0].mxu0 %vm90_vm0, %v1547_v23  ;;  %v1912_v23 = vpack.c.bf16 %v1016_v16, %v1015_v15 }
  0x90   :  { %1693 = vmatprep.mubr.msk.f32.mxu0 %vm1964_vm3, %v1962_v20  ;;  %v520_v40 = vpop.permute.xlu0 %519 }
  0x91   :  { %v360_v30 = vpop.permute.xlu1 %359  ;;  %vm521_vm7 = vcmp.eq.s32.totalorder %v520_v40, %v2112_v18  ;;  %v1245_v40 = vld [vmem:[%s2404_s13 + $0x70] sm:$0xff] }
  0x92   :  { %vm361_vm4 = vcmp.eq.s32.totalorder %v360_v30, %v2112_v18  ;;  %v1559_v53 = vsel %vm521_vm7, 1.0, %v1962_v20  ;;  %v1915_v30 = vpack.c.bf16 %v1018_v26, %v1017_v25  ;;  %v1335_v25 = vld [vmem:[%s2407_s15 + $0x20] sm:$0xff]  ;;  %v1336_v26 = vld [vmem:[%s2407_s15 + $0x28] sm:$0xff] }
  0x93   :  { %v1555_v44 = vsel %vm361_vm4, 1.0, %v1962_v20 }
  0x94   :  { %v600_v49 = vpop.permute.xlu0 %599 }
  0x95   :  { %v279_v36 = vpop.permute.xlu1 %278  ;;  %vm601_vm9 = vcmp.eq.s32.totalorder %v600_v49, %v2112_v18  ;;  %v926_v49 = vld [vmem:[%s2405_s11 + $0x20] sm:$0xff] }
  0x96   :  { %vm280_vm5 = vcmp.eq.s32.totalorder %v279_v36, %v2112_v18  ;;  %v1561_v61 = vsel %vm601_vm9, 1.0, %v1962_v20 }
  0x97   :  { %v1553_v45 = vsel %vm280_vm5, 1.0, %v1962_v20 }
  0x99   :  { %v440_v46 = vpop.permute.xlu1 %439 }
  0x9a   :  { %vm441_vm8 = vcmp.eq.s32.totalorder %v440_v46, %v2112_v18  ;;  %v924_v46 = vld [vmem:[%s2405_s11 + $0x10] sm:$0xff] }
  0x9b   :  { %v1557_v54 = vsel %vm441_vm8, 1.0, %v1962_v20  ;;  %v1903_v48 = vpack.c.bf16 %v925_v47, %v924_v46  ;;  %v1423_v46 = vld [vmem:[%s2408_s17 + $0x10] sm:$0xff]  ;;  %v1424_v47 = vld [vmem:[%s2408_s17 + $0x18] sm:$0xff] }
 0x162   :  { %v1677_v27 = vpop.f32.mrb[0].mxu0 }
 0x163   :  { %v163_v28 = vpop.f32.mrb[1].mxu0 }
 0x164   :  { %1686 = vmatprep.mubr.msk.f32.mxu1 %vm90_vm0, %v163_v28 }
 0x165   :  { %1687 = vmatmul.mubr.msk.f32.vlgmr.msra.gmra.mrb[0].mxu1 %vm90_vm0, %v1677_v27 }
 0x166   :  { %1700 = vmatprep.mubr.msk.f32.mxu1 %vm1964_vm3, %v1962_v20 }
 0x238   :  { %v1688_v32 = vpop.f32.mrb[0].mxu1 }
 0x239   :  { %v261_v33 = vadd.f32 %v1688_v32, %v1550_v31  ;;  %v255_v34 = vpop.f32.mrb[1].mxu1  ;;  %v1012_v32 = vld [vmem:[%s2404_s13 + $0x8] sm:$0xff] }
 0x23a   :  { %v256_v35 = vadd.f32 %v1550_v31, %v255_v34  ;;  %v1011_v31 = vld [vmem:[%s2404_s13] sm:$0xff]  ;;  %v1013_v34 = vld [vmem:[%s2404_s13 + $0x10] sm:$0xff] }
 0x23b   :  { %v265_v37 = vmax.f32 %v261_v33, 0.0  ;;  %v1918_v33 = vpack.c.bf16 %v1012_v32, %v1011_v31  ;;  %v1421_v32 = vld [vmem:[%s2408_s17] sm:$0xff] }
 0x23c   :  { %v264_v38 = vmax.f32 %v256_v35, 0.0  ;;  %v1014_v35 = vld [vmem:[%s2404_s13 + $0x18] sm:$0xff] }
 0x23d   :  { %v267_v39 = vsel %vm90_vm0, %v265_v37, 0.0  ;;  %v1921_v36 = vpack.c.bf16 %v1014_v35, %v1013_v34 }
 0x23e   :  { %v266_v41 = vsel %vm90_vm0, %v264_v38, 0.0  ;;  %v1867_v42 = vpack.c.bf16 %v265_v37, %v264_v38  ;;  %v1243_v37 = vld [vmem:[%s2404_s13 + $0x60] sm:$0xff]  ;;  %v1244_v38 = vld [vmem:[%s2404_s13 + $0x68] sm:$0xff] }
 0x23f   :  { %v268_v43 = vadd.f32 %v267_v39, %v266_v41  ;;  %v1930_v39 = vpack.c.bf16 %v1244_v38, %v1243_v37  ;;  %v1246_v41 = vld [vmem:[%s2404_s13 + $0x78] sm:$0xff] }
 0x240   :  { %1868 = vmatpush3.bf16.msra.mxu0 %v1867_v42  ;;  %1871 = vmatpush3.bf16.msra.mxu1 %v1867_v42 }
 0x241   :  { %1872 = vmatprep.subr.bf16.mxu0 %v1963_v29  ;;  %1875 = vmatprep.subr.bf16.mxu1 %v1963_v29  ;;  %v269_v63 = vrot.slane %v268_v43, 4 }
 0x243   :  { %1694 = vmatmul.mubr.msk.f32.vlgmr.msra.gmra.mrb[2].mxu0 %vm283_vm6, %v1553_v45  ;;  %1701 = vmatmul.mubr.msk.f32.vlgmr.msra.gmra.mrb[2].mxu1 %vm283_vm6, %v1555_v44  ;;  %v270_v0 = vadd.f32 %v269_v63, %v268_v43  ;;  %v922_v43 = vld [vmem:[%s2405_s11] sm:$0xff]  ;;  %v923_v44 = vld [vmem:[%s2405_s11 + $0x8] sm:$0xff] }
 0x244   :  { %1874 = vmatpush3.bf16.msra.mxu0 %v1867_v42  ;;  %1877 = vmatpush3.bf16.msra.mxu1 %v1867_v42  ;;  %v1900_v45 = vpack.c.bf16 %v923_v44, %v922_v43 }
 0x245   :  { %1707 = vmatprep.mubr.msk.f32.mxu0 %vm1964_vm3, %v1962_v20  ;;  %1714 = vmatprep.mubr.msk.f32.mxu1 %vm1964_vm3, %v1962_v20  ;;  %v271_v1 = vrot.slane %v270_v0, 2 }
 0x246   :  { %1878 = vmatprep.subr.bf16.mxu0 %v1963_v29  ;;  %1881 = vmatprep.subr.bf16.mxu1 %v1963_v29 }
 0x247   :  { %1708 = vmatmul.mubr.msk.f32.vlgmr.msra.gmra.mrb[4].mxu0 %vm283_vm6, %v1557_v54  ;;  %1715 = vmatmul.mubr.msk.f32.vlgmr.msra.gmra.mrb[4].mxu1 %vm283_vm6, %v1559_v53  ;;  %v272_v2 = vadd.f32 %v271_v1, %v270_v0  ;;  %v929_v53 = vld [vmem:[%s2405_s11 + $0x38] sm:$0xff]  ;;  %v1566_v1 = vld [vmem:[%s2406_s10] ss:$0 sm:$0xff] }
 0x248   :  { %1880 = vmatpush3.bf16.msra.mxu0 %v1867_v42  ;;  %1721 = vmatprep.mubr.msk.f32.mxu0 %vm1964_vm3, %v1962_v20  ;;  %v1933_v42 = vpack.c.bf16 %v1246_v41, %v1245_v40  ;;  %v1909_v54 = vpack.c.bf16 %v929_v53, %v928_v52 }
 0x249   :  { %1883 = vmatpush3.bf16.msra.mxu1 %v1882_v50  ;;  %1887 = vmatprep.subr.bf16.mxu0 %v1963_v29  ;;  %v273_v6 = vrot.slane %v272_v2, 1  ;;  %v927_v50 = vld [vmem:[%s2405_s11 + $0x28] sm:$0xff] }
 0x24a   :  { %1884 = vmatprep.subr.bf16.mxu1 %v1963_v29  ;;  %1732 = vmatprep.mubr.msk.f32.mxu1 %vm1964_vm3, %v1962_v20  ;;  %v1906_v51 = vpack.c.bf16 %v927_v50, %v926_v49  ;;  %v1574_v49 = vld [vmem:[%s2411_s16] ss:$0 sm:$0xff] }
 0x24b   :  { %1722 = vmatmul.mubr.msk.f32.vlgmr.msra.gmra.mrb[6].mxu0 %vm283_vm6, %v1561_v61  ;;  %v274_v14 = vadd.f32 %v273_v6, %v272_v2  ;;  %v910_v61 = vsub.s32 0, %v909_v60  ;;  %v1579_v60 = vld [vmem:[%s2414_s19] ss:$0 sm:$0xff] }
 0x24c   :  { %1889 = vmatpush3.bf16.msra.mxu0 %v1888_v57  ;;  %1743 = vmatprep.mubr.msk.f32.mxu0 %vm1964_vm3, %v1962_v20 }
 0x24d   :  { %1886 = vmatpush3.bf16.msra.mxu1 %v1885_v58  ;;  %1890 = vmatprep.subr.bf16.mxu0 %v1963_v29  ;;  %v275_v24 = vmul.f32 0.0625, %v274_v14 }
 0x24e   :  { %1893 = vmatprep.subr.bf16.mxu1 %v1963_v29 }
 0x250   :  { %1892 = vmatpush3.bf16.msra.mxu0 %v1891_v62 }
 0x251   :  { %1899 = vmatprep.subr.bf16.mxu0 %v1963_v29 }
 0x316   :  { %v353_v9 = vpop.f32.mrb[2].mxu0  ;;  %v433_v10 = vpop.f32.mrb[2].mxu1 }
 0x317   :  { %v1695_v11 = vpop.f32.mrb[3].mxu0  ;;  %v1702_v12 = vpop.f32.mrb[3].mxu1  ;;  %1733 = vmatmul.mubr.msk.f32.vlgmr.msra.gmra.mrb[6].mxu1 %vm90_vm0, %v433_v10  ;;  %1744 = vmatmul.mubr.msk.f32.vlgmr.msra.gmra.mrb[8].mxu0 %vm90_vm0, %v353_v9 }
 0x318   :  { %1895 = vmatpush3.bf16.msra.mxu1 %v1894_v5  ;;  %1754 = vmatprep.mubr.msk.f32.mxu1 %vm1964_vm3, %v1962_v20  ;;  %v1927_v11 = vpack.c.bf16 %v1168_v8, %v1167_v7 }
 0x319   :  { %1896 = vmatprep.subr.bf16.mxu1 %v1963_v29  ;;  %1773 = vmatprep.mubr.msk.f32.mxu0 %vm1964_vm3, %v1962_v20 }
 0x31a   :  { %v513_v18 = vpop.f32.mrb[4].mxu0  ;;  %v593_v19 = vpop.f32.mrb[4].mxu1  ;;  %1901 = vmatpush3.bf16.msra.mxu0 %v1900_v45 }
 0x31b   :  { %v1709_v21 = vpop.f32.mrb[5].mxu0  ;;  %v1716_v22 = vpop.f32.mrb[5].mxu1  ;;  %1902 = vmatprep.subr.bf16.mxu0 %v1963_v29 }
 0x31c   :  { %1898 = vmatpush3.bf16.msra.mxu1 %v1897_v13  ;;  %v1332_v21 = vld [vmem:[%s2407_s15 + $0x8] sm:$0xff] }
 0x31d   :  { %1911 = vmatprep.subr.bf16.mxu1 %v1963_v29 }
 0x31e   :  { %v2232_v27 = vpop.f32.mrb[6].mxu0  ;;  %1904 = vmatpush3.bf16.msra.mxu0 %v1903_v48  ;;  %v1951_v48 = vpack.c.bf16 %v1424_v47, %v1423_v46 }
 0x31f   :  { %1755 = vmatmul.mubr.msk.f32.vlgmr.msra.gmra.mrb[8].mxu1 %vm90_vm0, %v275_v24  ;;  %v1723_v28 = vpop.f32.mrb[7].mxu0  ;;  %1905 = vmatprep.subr.bf16.mxu0 %v1963_v29 }
 0x320   :  { %1913 = vmatpush3.bf16.msra.mxu1 %v1912_v23  ;;  %1784 = vmatprep.mubr.msk.f32.mxu1 %vm1964_vm3, %v1962_v20  ;;  %v1333_v23 = vld [vmem:[%s2407_s15 + $0x10] sm:$0xff] }
 0x321   :  { %1914 = vmatprep.subr.bf16.mxu1 %v1963_v29  ;;  %v1337_v28 = vld [vmem:[%s2407_s15 + $0x30] sm:$0xff] }
 0x322   :  { %1907 = vmatpush3.bf16.msra.mxu0 %v1906_v51 }
 0x323   :  { %1908 = vmatprep.subr.bf16.mxu0 %v1963_v29 }
 0x324   :  { %1916 = vmatpush3.bf16.msra.mxu1 %v1915_v30  ;;  %v1338_v30 = vld [vmem:[%s2407_s15 + $0x38] sm:$0xff] }
 0x325   :  { %1917 = vmatprep.subr.bf16.mxu1 %v1963_v29  ;;  %v1945_v31 = vpack.c.bf16 %v1338_v30, %v1337_v28 }
 0x326   :  { %1910 = vmatpush3.bf16.msra.mxu0 %v1909_v54  ;;  %v26_v54 = vstv %s2412_s20 }
 0x327   :  { %1785 = vmatmul.mubr.msk.f32.vlgmr.msra.gmra.mrb[10].mxu1 %vm90_vm0, %v593_v19  ;;  %1923 = vmatprep.subr.bf16.mxu0 %v1963_v29  ;;  %v1331_v19 = vld [vmem:[%s2407_s15] sm:$0xff]  ;;  %27 = vst [vmem:[#allocation2] sm:$0x1] %v26_v54 }
 0x328   :  { %1919 = vmatpush3.bf16.msra.mxu1 %v1918_v33  ;;  %1795 = vmatprep.mubr.msk.f32.mxu1 %vm1964_vm3, %v1962_v20  ;;  %v1936_v22 = vpack.c.bf16 %v1332_v21, %v1331_v19  ;;  %v1422_v33 = vld [vmem:[%s2408_s17 + $0x8] sm:$0xff] }
 0x329   :  { %1920 = vmatprep.subr.bf16.mxu1 %v1963_v29  ;;  %v1947_v34 = vpack.c.bf16 %v1422_v33, %v1421_v32 }
 0x32c   :  { %1922 = vmatpush3.bf16.msra.mxu1 %v1921_v36 }
 0x32d   :  { %1929 = vmatprep.subr.bf16.mxu1 %v1963_v29 }
 0x32e   :  { %v1580_v3 = vld [vmem:[#allocation2] ss:$0 sm:$0xff] }
 0x32f   :  { %1796 = vmatmul.mubr.msk.f32.vlgmr.msra.gmra.mrb[12].mxu1 %vm90_vm0, %v513_v18 }
 0x330   :  { %1931 = vmatpush3.bf16.msra.mxu1 %v1930_v39  ;;  %1817 = vmatprep.mubr.msk.f32.mxu1 %vm1964_vm3, %v1962_v20 }
 0x331   :  { %1932 = vmatprep.subr.bf16.mxu1 %v1963_v29 }
 0x334   :  { %1934 = vmatpush3.bf16.msra.mxu1 %v1933_v42  ;;  %v1573_v42 = vld [vmem:[%s2410_s14] ss:$0 sm:$0xff] }
 0x335   :  { %1948 = vmatprep.subr.bf16.mxu1 %v1947_v34 }
 0x337   :  { %1818 = vmatmul.mubr.msk.f32.vlgmr.msra.gmra.mrb[14].mxu1 %vm90_vm0, %v275_v24 }
 0x338   :  { %1950 = vmatpush3.bf16.msra.mxu1 %v1947_v34 }
 0x339   :  { %1952 = vmatprep.subr.bf16.mxu1 %v1951_v48 }
 0x33c   :  { %1954 = vmatpush3.bf16.msra.mxu1 %v1951_v48 }
 0x3ea   :  { %v754_v55 = vpop.f32.mrb[6].mxu1  ;;  %v827_v56 = vpop.f32.mrb[8].mxu0 }
 0x3eb   :  { %v828_v57 = vadd.f32 %v827_v56, %v754_v55  ;;  %v1734_v58 = vpop.f32.mrb[7].mxu1  ;;  %v1745_v59 = vpop.f32.mrb[9].mxu0  ;;  %v1576_v55 = vld [vmem:[%s2413_s18] ss:$0 sm:$0xff] }
 0x3f2   :  { %v904_v62 = vpop.f32.mrb[8].mxu1 }
 0x3f3   :  { %v911_v63 = vrot.slane %v904_v62, %v910_v61  ;;  %v1756_v0 = vpop.f32.mrb[9].mxu1 }
 0x3f5   :  { %v912_v2 = vadd.f32 %v911_v63, %v828_v57 }
 0x3f7   :  { %v920_v5 = vadd.f32 %v1566_v1, %v912_v2 }
 0x3f9   :  { %v921_v6 = vmax.f32 %v920_v5, 0.0 }
 0x3fa   :  { %v1088_v9 = vpop.f32.mrb[10].mxu1 }
 0x3fb   :  { %1774 = vmatmul.mubr.msk.f32.vlgmr.msra.gmra.mrb[10].mxu0 %vm937_vm10, %v921_v6  ;;  %v1786_v10 = vpop.f32.mrb[11].mxu1 }
 0x3fc   :  { %1925 = vmatpush3.bf16.msra.mxu0 %v1924_v17  ;;  %1806 = vmatprep.mubr.msk.f32.mxu0 %vm1964_vm3, %v1962_v20 }
 0x3fd   :  { %1926 = vmatprep.subr.bf16.mxu0 %v1963_v29 }
 0x400   :  { %1928 = vmatpush3.bf16.msra.mxu0 %v1927_v11 }
 0x401   :  { %1935 = vmatprep.subr.bf16.mxu0 %v1963_v29 }
 0x402   :  { %v1161_v12 = vpop.f32.mrb[12].mxu1 }
 0x403   :  { %v1162_v13 = vadd.f32 %v1161_v12, %v1088_v9  ;;  %1807 = vmatmul.mubr.msk.f32.vlgmr.msra.gmra.mrb[12].mxu0 %vm90_vm0, %v2232_v27  ;;  %v1797_v14 = vpop.f32.mrb[13].mxu1  ;;  %v1942_v27 = vpack.c.bf16 %v1336_v26, %v1335_v25 }
 0x404   :  { %1836 = vmatprep.mubr.msk.f32.mxu0 %vm1964_vm3, %v1962_v20  ;;  %1937 = vmatpush3.bf16.msra.mxu0 %v1936_v22  ;;  %v1334_v20 = vld [vmem:[%s2407_s15 + $0x18] sm:$0xff] }
 0x405   :  { %1938 = vmatprep.subr.bf16.mxu0 %v1963_v29  ;;  %v1939_v24 = vpack.c.bf16 %v1334_v20, %v1333_v23 }
 0x408   :  { %1940 = vmatpush3.bf16.msra.mxu0 %v1939_v24 }
 0x409   :  { %1941 = vmatprep.subr.bf16.mxu0 %v1963_v29 }
 0x40a   :  { %v1313_v15 = vpop.f32.mrb[14].mxu1 }
 0x40b   :  { %v1320_v16 = vrot.slane %v1313_v15, %v910_v61  ;;  %v1819_v18 = vpop.f32.mrb[15].mxu1 }
 0x40c   :  { %1943 = vmatpush3.bf16.msra.mxu0 %v1942_v27 }
 0x40d   :  { %1944 = vmatprep.subr.bf16.mxu0 %v1963_v29  ;;  %v1567_v29 = vld [vmem:[%s2409_s12] ss:$0 sm:$0xff] }
 0x410   :  { %1946 = vmatpush3.bf16.msra.mxu0 %v1945_v31 }
 0x4ce   :  { %v1007_v35 = vpop.f32.mrb[10].mxu0 }
 0x4cf   :  { %v1008_v36 = vadd.f32 %v1567_v29, %v1007_v35  ;;  %v1775_v37 = vpop.f32.mrb[11].mxu0 }
 0x4d1   :  { %v1419_v38 = vmax.f32 %v1008_v36, 0.0 }
 0x4d3   :  { %1847 = vmatprep.mubr.msk.f32.mxu1 %vm90_vm0, %v1419_v38 }
 0x4d6   :  { %v1238_v39 = vpop.f32.mrb[12].mxu0 }
 0x4d7   :  { %v1242_v40 = vadd.f32 %v1238_v39, %v1162_v13  ;;  %v1808_v41 = vpop.f32.mrb[13].mxu0 }
 0x4d9   :  { %v1321_v43 = vadd.f32 %v1320_v16, %v1242_v40 }
 0x4db   :  { %v1329_v44 = vadd.f32 %v1573_v42, %v1321_v43 }
 0x4dd   :  { %v1330_v45 = vmax.f32 %v1329_v44, 0.0 }
 0x4df   :  { %1837 = vmatmul.mubr.msk.f32.vlgmr.msra.gmra.mrb[14].mxu0 %vm937_vm10, %v1330_v45 }
 0x5b2   :  { %v1415_v50 = vpop.f32.mrb[14].mxu0 }
 0x5b3   :  { %v1416_v51 = vadd.f32 %v1574_v49, %v1415_v50  ;;  %v1838_v52 = vpop.f32.mrb[15].mxu0 }
 0x5b5   :  { %v1420_v53 = vmax.f32 %v1416_v51, 0.0 }
 0x5b7   :  { %1848 = vmatmul.mubr.msk.f32.vlgmr.msra.gmra.mrb[16].mxu1 %vm90_vm0, %v1420_v53 }
 0x68a   :  { %v1849_v56 = vpop.f32.mrb[16].mxu1 }
 0x68b   :  { %v1510_v57 = vadd.f32 %v1849_v56, %v1576_v55  ;;  %v1504_v58 = vpop.f32.mrb[17].mxu1 }
 0x68c   :  { %v1505_v59 = vadd.f32 %v1576_v55, %v1504_v58 }
 0x68d   :  { %v1514_v61 = vmax.f32 %v1510_v57, 0.0 }
 0x68e   :  { %v1513_v62 = vmax.f32 %v1505_v59, 0.0 }
 0x68f   :  { %v1523_v63 = vmul.f32 %v1579_v60, %v1514_v61 }
 0x690   :  { %v1522_v0 = vmul.f32 %v1579_v60, %v1513_v62 }
 0x691   :  { %v1527_v1 = vsel %vm90_vm0, %v1523_v63, 0.0 }
 0x692   :  { %1528 = vadd.xlane.f32.xlu0 %v1527_v1  ;;  %v1524_v2 = vsel %vm90_vm0, %v1522_v0, 0.0 }
 0x693   :  { %1525 = vadd.xlane.f32.xlu1 %v1524_v2 }
 0x71f   :  { %v1529_v4 = vpop.xlane.xlu0 %1528 }
 0x720   :  { %v1538_v5 = vadd.f32 %v1580_v3, %v1529_v4  ;;  %v1526_v17 = vpop.xlane.xlu1 %1525 }
 0x721   :  { %v1537_v6 = vadd.f32 %v1580_v3, %v1526_v17 }
 0x722   :  { %1541 = vst.msk [vmem:[%s2415_s21 + $0x8] sm:$0xff] %vm1539_vm11, %v1538_v5 }
 0x723   :  { %1540 = vst.msk [vmem:[%s2415_s21] sm:$0xff] %vm1539_vm11, %v1537_v6 }

</bundles_post_ra>
